<compile_context>
chip_gen: v6e
topology: v6e:2x2x1
jax: 0.10.0
libtpu: 0.0.40
codegen_flags: <defaults>
</compile_context>

<pallas_src>
import math

import jax
import jax.numpy as jnp
from jax import lax
from jax.experimental import pallas as pl
from jax.experimental.pallas import tpu as pltpu

# Model hyperparameters (small, consistent with a toy decoder block).
B = 2            # batch
S = 8            # sequence length
D = 32           # hidden size
H = 4            # number of heads
HD = D // H      # head dim
BS = B * S       # flattened batch*seq rows handled in one kernel invocation
SCALE = 1.0 / math.sqrt(HD)
NEG_INF = -1e30  # safe in f32 (scores are computed in f32)

assert S & (S - 1) == 0, "S must be a power of two for the shift-based mask"
LOG2_S = S.bit_length() - 1


def decoder_attn_kernel(x_ref, w_ref, o_ref, ocat_ref):
    """Single invocation: whole flattened batch + packed bf16 weights."""
    x = x_ref[...].astype(jnp.bfloat16)              # (BS, D)   bf16 MXU operand
    w = w_ref[...]                                   # (D, 4D)   bf16 [Wq*s|Wk|Wv|Wo]

    # Fused QKV projection: one MXU pass over the 96-lane slice of the packed tile.
    qkv = jnp.dot(x, w[:, :3 * D], preferred_element_type=jnp.float32)   # (BS, 3D) f32
    wo = w[:, 3 * D:]                                # (D, D)    bf16

    # Block-diagonal causal additive bias over the flattened (B*S) axis,
    # hoisted out of the head loop (one f32 vadd per head instead of a vselect).
    row = lax.broadcasted_iota(jnp.int32, (BS, BS), 0)
    col = lax.broadcasted_iota(jnp.int32, (BS, BS), 1)
    same_batch = lax.shift_right_logical(row, LOG2_S) == lax.shift_right_logical(col, LOG2_S)
    mask = jnp.logical_and(same_batch, col <= row)   # (BS, BS) bool
    bias = jnp.where(mask, 0.0, NEG_INF).astype(jnp.float32)

    # Per-head attention.  H=4 static iterations, fully unrolled; every op is a
    # plain 2-D matmul (bf16 operands, f32 accumulate) or static slice.
    # Wq was pre-scaled by 1/sqrt(HD) at packing time -> no per-head scaling.
    nt_dims = (((1,), (1,)), ((), ()))               # contract last dims: q @ k^T
    for h in range(H):
        lo = h * HD
        qh = qkv[:, lo:lo + HD].astype(jnp.bfloat16)              # (BS, HD)
        kh = qkv[:, D + lo:D + lo + HD].astype(jnp.bfloat16)      # (BS, HD)
        vh = qkv[:, 2 * D + lo:2 * D + lo + HD].astype(jnp.bfloat16)

        s = lax.dot_general(qh, kh, nt_dims,
                            preferred_element_type=jnp.float32) + bias   # (BS, BS) f32

        # Numerically-stable softmax in f32; reciprocal on the EUP slot.
        m = jnp.max(s, axis=-1, keepdims=True)
        p = jnp.exp(s - m)
        p = p * pl.reciprocal(jnp.sum(p, axis=-1, keepdims=True), approx=True)

        oh = jnp.dot(p.astype(jnp.bfloat16), vh,
                     preferred_element_type=jnp.float32)                  # (BS, HD) f32
        ocat_ref[:, lo:lo + HD] = oh                 # assemble concat_h(o_h) in VMEM

    # Single fused output projection: (BS, D) @ (D, D), K=32 contraction.
    out = jnp.dot(ocat_ref[...].astype(jnp.bfloat16), wo,
                  preferred_element_type=jnp.float32)
    o_ref[...] = out.astype(o_ref.dtype)


def pack_weights(wq, wk, wv, wo):
    """Done ONCE at init: pre-scale Wq, pack lane-dense (D, 4D), cast to bf16."""
    return jnp.concatenate([wq * SCALE, wk, wv, wo], axis=1).astype(jnp.bfloat16)


@jax.jit
def decoder_attn(x, w_packed):
    b, s, d = x.shape
    assert (b, s, d) == (B, S, D)
    assert w_packed.shape == (D, 4 * D)

    x2 = x.reshape(BS, D)                            # flatten batch*seq (metadata only)

    out = pl.pallas_call(
        decoder_attn_kernel,
        out_shape=jax.ShapeDtypeStruct((BS, D), x.dtype),
        in_specs=[
            pl.BlockSpec(memory_space=pltpu.MemorySpace.VMEM),   # activations, whole array
            pl.BlockSpec(memory_space=pltpu.MemorySpace.VMEM),   # packed bf16 weights
        ],
        out_specs=pl.BlockSpec(memory_space=pltpu.MemorySpace.VMEM),
        scratch_shapes=[pltpu.VMEM((BS, D), jnp.float32)],        # concat_h(o_h) buffer
        cost_estimate=pl.CostEstimate(
            flops=170_000, transcendentals=1_100, bytes_accessed=12_288),
    )(x2, w_packed)
    return out.reshape(B, S, D)


def reference_attn(x, wq, wk, wv, wo):
    """Pure-JAX f32 reference for a correctness check."""
    xf = x.astype(jnp.float32)
    q = xf @ wq
    k = xf @ wk
    v = xf @ wv
    qh = q.reshape(B, S, H, HD).transpose(0, 2, 1, 3)
    kh = k.reshape(B, S, H, HD).transpose(0, 2, 1, 3)
    vh = v.reshape(B, S, H, HD).transpose(0, 2, 1, 3)
    s = jnp.einsum("bhqd,bhkd->bhqk", qh, kh) * SCALE
    mask = jnp.tril(jnp.ones((S, S), dtype=bool))
    s = jnp.where(mask[None, None], s, NEG_INF)
    p = jax.nn.softmax(s, axis=-1)
    o = jnp.einsum("bhqk,bhkd->bhqd", p, vh)
    o = o.transpose(0, 2, 1, 3).reshape(B, S, D)
    return (o @ wo).astype(x.dtype)


if __name__ == "__main__":
    key = jax.random.PRNGKey(0)
    kx, kq, kk, kv, ko = jax.random.split(key, 5)

    x = jax.random.normal(kx, (B, S, D), dtype=jnp.float32)
    # Deterministic parameter init (synthetic weights, no checkpoint).
    wq = 0.02 * jax.random.normal(kq, (D, D), dtype=jnp.float32)
    wk = 0.02 * jax.random.normal(kk, (D, D), dtype=jnp.float32)
    wv = 0.02 * jax.random.normal(kv, (D, D), dtype=jnp.float32)
    wo = 0.02 * jax.random.normal(ko, (D, D), dtype=jnp.float32)

    # Pack + pre-scale weights once at init (hoisted out of the call path).
    w_packed = jax.block_until_ready(pack_weights(wq, wk, wv, wo))

    out = decoder_attn(x, w_packed)
    out = jax.block_until_ready(out)

    ref = reference_attn(x, wq, wk, wv, wo)
    assert out.shape == (B, S, D)
    # Tolerance loosened for bf16 MXU operands + approximate reciprocal
    # (reference is computed fully in f32).
    assert jnp.allclose(out, ref, atol=2e-3, rtol=2e-2), "mismatch vs reference"

    print("KERNEL_OK")
</pallas_src>

<mosaic_0001>
module attributes {stable_mosaic.version = 11 : i64} {
  func.func @decoder_attn_kernel(%arg0: memref<16x32xf32, #tpu.memory_space<vmem>>, %arg1: memref<32x128xbf16, #tpu.memory_space<vmem>>, %arg2: memref<16x32xf32, #tpu.memory_space<vmem>>, %arg3: memref<16x32xf32, #tpu.memory_space<vmem>>) attributes {dimension_semantics = [], scalar_prefetch = 0 : i64, scratch_operands = 1 : i64, tpu.core_type = #tpu.core_type<tc>} {
    %c0 = arith.constant 0 : index
    %c0_0 = arith.constant 0 : index
    %0 = vector.load %arg0[%c0, %c0_0] : memref<16x32xf32, #tpu.memory_space<vmem>>, vector<16x32xf32>
    %1 = arith.truncf %0 : vector<16x32xf32> to vector<16x32xbf16>
    %c0_1 = arith.constant 0 : index
    %c0_2 = arith.constant 0 : index
    %2 = vector.load %arg1[%c0_1, %c0_2] : memref<32x128xbf16, #tpu.memory_space<vmem>>, vector<32x128xbf16>
    %3 = vector.extract_strided_slice %2 {offsets = [0, 0], sizes = [32, 96], strides = [1, 1]} : vector<32x128xbf16> to vector<32x96xbf16>
    %cst = arith.constant dense<0.000000e+00> : vector<16x96xf32>
    %4 = tpu.matmul %1, %3, %cst {dimension_numbers = #tpu.dot_dimension_numbers<[1], [0], [0], [1], [0, 0, 1, 1], [], []>} : vector<16x32xbf16>, vector<32x96xbf16>, vector<16x96xf32> -> vector<16x96xf32>
    %5 = vector.extract_strided_slice %2 {offsets = [0, 96], sizes = [32, 32], strides = [1, 1]} : vector<32x128xbf16> to vector<32x32xbf16>
    %6 = tpu.iota {dimensions = array<i32: 0>} : vector<16x16xi32>
    %7 = tpu.iota {dimensions = array<i32: 1>} : vector<16x16xi32>
    %c3_i32 = arith.constant 3 : i32
    %8 = vector.broadcast %c3_i32 : i32 to vector<16x16xi32>
    %9 = arith.shrui %6, %8 : vector<16x16xi32>
    %c3_i32_3 = arith.constant 3 : i32
    %10 = vector.broadcast %c3_i32_3 : i32 to vector<16x16xi32>
    %11 = arith.shrui %7, %10 : vector<16x16xi32>
    %12 = arith.cmpi eq, %9, %11 : vector<16x16xi32>
    %13 = arith.cmpi sle, %7, %6 : vector<16x16xi32>
    %14 = arith.andi %12, %13 : vector<16x16xi1>
    %cst_4 = arith.constant 0.000000e+00 : f32
    %cst_5 = arith.constant -1.000000e+30 : f32
    %15 = vector.broadcast %cst_4 : f32 to vector<16x16xf32>
    %16 = vector.broadcast %cst_5 : f32 to vector<16x16xf32>
    %17 = arith.select %14, %15, %16 : vector<16x16xi1>, vector<16x16xf32>
    %18 = vector.extract_strided_slice %4 {offsets = [0, 0], sizes = [16, 8], strides = [1, 1]} : vector<16x96xf32> to vector<16x8xf32>
    %19 = arith.truncf %18 : vector<16x8xf32> to vector<16x8xbf16>
    %20 = vector.extract_strided_slice %4 {offsets = [0, 32], sizes = [16, 8], strides = [1, 1]} : vector<16x96xf32> to vector<16x8xf32>
    %21 = arith.truncf %20 : vector<16x8xf32> to vector<16x8xbf16>
    %22 = vector.extract_strided_slice %4 {offsets = [0, 64], sizes = [16, 8], strides = [1, 1]} : vector<16x96xf32> to vector<16x8xf32>
    %23 = arith.truncf %22 : vector<16x8xf32> to vector<16x8xbf16>
    %cst_6 = arith.constant dense<0.000000e+00> : vector<16x16xf32>
    %24 = tpu.matmul %19, %21, %cst_6 {dimension_numbers = #tpu.dot_dimension_numbers<[1], [1], [0], [0], [0, 0, 1, 0], [], []>} : vector<16x8xbf16>, vector<16x8xbf16>, vector<16x16xf32> -> vector<16x16xf32>
    %25 = arith.addf %24, %17 : vector<16x16xf32>
    %cst_7 = arith.constant dense<0xFF800000> : vector<16xf32>
    %26 = vector.multi_reduction <maximumf>, %25, %cst_7 [1] : vector<16x16xf32> to vector<16xf32>
    %27 = vector.shape_cast %26 : vector<16xf32> to vector<16x1xf32>
    %28 = vector.broadcast %27 : vector<16x1xf32> to vector<16x16xf32>
    %29 = arith.subf %25, %28 : vector<16x16xf32>
    %30 = math.exp %29 : vector<16x16xf32>
    %cst_8 = arith.constant dense<0.000000e+00> : vector<16xf32>
    %31 = vector.multi_reduction <add>, %30, %cst_8 [1] : vector<16x16xf32> to vector<16xf32>
    %32 = vector.shape_cast %31 : vector<16xf32> to vector<16x1xf32>
    %33 = tpu.reciprocal %32 {approx = true} : vector<16x1xf32> -> vector<16x1xf32>
    %34 = vector.broadcast %33 : vector<16x1xf32> to vector<16x16xf32>
    %35 = arith.mulf %30, %34 : vector<16x16xf32>
    %36 = arith.truncf %35 : vector<16x16xf32> to vector<16x16xbf16>
    %cst_9 = arith.constant dense<0.000000e+00> : vector<16x8xf32>
    %37 = tpu.matmul %36, %23, %cst_9 {dimension_numbers = #tpu.dot_dimension_numbers<[1], [0], [0], [1], [0, 0, 1, 1], [], []>} : vector<16x16xbf16>, vector<16x8xbf16>, vector<16x8xf32> -> vector<16x8xf32>
    %c0_10 = arith.constant 0 : index
    %c0_11 = arith.constant 0 : index
    %38 = vector.load %arg3[%c0_10, %c0_11] : memref<16x32xf32, #tpu.memory_space<vmem>>, vector<16x8xf32>
    tpu.vector_store %arg3[%c0_10, %c0_11], %37 {strides = array<i32>} : memref<16x32xf32, #tpu.memory_space<vmem>>, vector<16x8xf32>,
    %39 = vector.extract_strided_slice %4 {offsets = [0, 8], sizes = [16, 8], strides = [1, 1]} : vector<16x96xf32> to vector<16x8xf32>
    %40 = arith.truncf %39 : vector<16x8xf32> to vector<16x8xbf16>
    %41 = vector.extract_strided_slice %4 {offsets = [0, 40], sizes = [16, 8], strides = [1, 1]} : vector<16x96xf32> to vector<16x8xf32>
    %42 = arith.truncf %41 : vector<16x8xf32> to vector<16x8xbf16>
    %43 = vector.extract_strided_slice %4 {offsets = [0, 72], sizes = [16, 8], strides = [1, 1]} : vector<16x96xf32> to vector<16x8xf32>
    %44 = arith.truncf %43 : vector<16x8xf32> to vector<16x8xbf16>
    %cst_12 = arith.constant dense<0.000000e+00> : vector<16x16xf32>
    %45 = tpu.matmul %40, %42, %cst_12 {dimension_numbers = #tpu.dot_dimension_numbers<[1], [1], [0], [0], [0, 0, 1, 0], [], []>} : vector<16x8xbf16>, vector<16x8xbf16>, vector<16x16xf32> -> vector<16x16xf32>
    %46 = arith.addf %45, %17 : vector<16x16xf32>
    %cst_13 = arith.constant dense<0xFF800000> : vector<16xf32>
    %47 = vector.multi_reduction <maximumf>, %46, %cst_13 [1] : vector<16x16xf32> to vector<16xf32>
    %48 = vector.shape_cast %47 : vector<16xf32> to vector<16x1xf32>
    %49 = vector.broadcast %48 : vector<16x1xf32> to vector<16x16xf32>
    %50 = arith.subf %46, %49 : vector<16x16xf32>
    %51 = math.exp %50 : vector<16x16xf32>
    %cst_14 = arith.constant dense<0.000000e+00> : vector<16xf32>
    %52 = vector.multi_reduction <add>, %51, %cst_14 [1] : vector<16x16xf32> to vector<16xf32>
    %53 = vector.shape_cast %52 : vector<16xf32> to vector<16x1xf32>
    %54 = tpu.reciprocal %53 {approx = true} : vector<16x1xf32> -> vector<16x1xf32>
    %55 = vector.broadcast %54 : vector<16x1xf32> to vector<16x16xf32>
    %56 = arith.mulf %51, %55 : vector<16x16xf32>
    %57 = arith.truncf %56 : vector<16x16xf32> to vector<16x16xbf16>
    %cst_15 = arith.constant dense<0.000000e+00> : vector<16x8xf32>
    %58 = tpu.matmul %57, %44, %cst_15 {dimension_numbers = #tpu.dot_dimension_numbers<[1], [0], [0], [1], [0, 0, 1, 1], [], []>} : vector<16x16xbf16>, vector<16x8xbf16>, vector<16x8xf32> -> vector<16x8xf32>
    %c0_16 = arith.constant 0 : index
    %c8 = arith.constant 8 : index
    %59 = vector.load %arg3[%c0_16, %c8] : memref<16x32xf32, #tpu.memory_space<vmem>>, vector<16x8xf32>
    tpu.vector_store %arg3[%c0_16, %c8], %58 {strides = array<i32>} : memref<16x32xf32, #tpu.memory_space<vmem>>, vector<16x8xf32>,
    %60 = vector.extract_strided_slice %4 {offsets = [0, 16], sizes = [16, 8], strides = [1, 1]} : vector<16x96xf32> to vector<16x8xf32>
    %61 = arith.truncf %60 : vector<16x8xf32> to vector<16x8xbf16>
    %62 = vector.extract_strided_slice %4 {offsets = [0, 48], sizes = [16, 8], strides = [1, 1]} : vector<16x96xf32> to vector<16x8xf32>
    %63 = arith.truncf %62 : vector<16x8xf32> to vector<16x8xbf16>
    %64 = vector.extract_strided_slice %4 {offsets = [0, 80], sizes = [16, 8], strides = [1, 1]} : vector<16x96xf32> to vector<16x8xf32>
    %65 = arith.truncf %64 : vector<16x8xf32> to vector<16x8xbf16>
    %cst_17 = arith.constant dense<0.000000e+00> : vector<16x16xf32>
    %66 = tpu.matmul %61, %63, %cst_17 {dimension_numbers = #tpu.dot_dimension_numbers<[1], [1], [0], [0], [0, 0, 1, 0], [], []>} : vector<16x8xbf16>, vector<16x8xbf16>, vector<16x16xf32> -> vector<16x16xf32>
    %67 = arith.addf %66, %17 : vector<16x16xf32>
    %cst_18 = arith.constant dense<0xFF800000> : vector<16xf32>
    %68 = vector.multi_reduction <maximumf>, %67, %cst_18 [1] : vector<16x16xf32> to vector<16xf32>
    %69 = vector.shape_cast %68 : vector<16xf32> to vector<16x1xf32>
    %70 = vector.broadcast %69 : vector<16x1xf32> to vector<16x16xf32>
    %71 = arith.subf %67, %70 : vector<16x16xf32>
    %72 = math.exp %71 : vector<16x16xf32>
    %cst_19 = arith.constant dense<0.000000e+00> : vector<16xf32>
    %73 = vector.multi_reduction <add>, %72, %cst_19 [1] : vector<16x16xf32> to vector<16xf32>
    %74 = vector.shape_cast %73 : vector<16xf32> to vector<16x1xf32>
    %75 = tpu.reciprocal %74 {approx = true} : vector<16x1xf32> -> vector<16x1xf32>
    %76 = vector.broadcast %75 : vector<16x1xf32> to vector<16x16xf32>
    %77 = arith.mulf %72, %76 : vector<16x16xf32>
    %78 = arith.truncf %77 : vector<16x16xf32> to vector<16x16xbf16>
    %cst_20 = arith.constant dense<0.000000e+00> : vector<16x8xf32>
    %79 = tpu.matmul %78, %65, %cst_20 {dimension_numbers = #tpu.dot_dimension_numbers<[1], [0], [0], [1], [0, 0, 1, 1], [], []>} : vector<16x16xbf16>, vector<16x8xbf16>, vector<16x8xf32> -> vector<16x8xf32>
    %c0_21 = arith.constant 0 : index
    %c16 = arith.constant 16 : index
    %80 = vector.load %arg3[%c0_21, %c16] : memref<16x32xf32, #tpu.memory_space<vmem>>, vector<16x8xf32>
    tpu.vector_store %arg3[%c0_21, %c16], %79 {strides = array<i32>} : memref<16x32xf32, #tpu.memory_space<vmem>>, vector<16x8xf32>,
    %81 = vector.extract_strided_slice %4 {offsets = [0, 24], sizes = [16, 8], strides = [1, 1]} : vector<16x96xf32> to vector<16x8xf32>
    %82 = arith.truncf %81 : vector<16x8xf32> to vector<16x8xbf16>
    %83 = vector.extract_strided_slice %4 {offsets = [0, 56], sizes = [16, 8], strides = [1, 1]} : vector<16x96xf32> to vector<16x8xf32>
    %84 = arith.truncf %83 : vector<16x8xf32> to vector<16x8xbf16>
    %85 = vector.extract_strided_slice %4 {offsets = [0, 88], sizes = [16, 8], strides = [1, 1]} : vector<16x96xf32> to vector<16x8xf32>
    %86 = arith.truncf %85 : vector<16x8xf32> to vector<16x8xbf16>
    %cst_22 = arith.constant dense<0.000000e+00> : vector<16x16xf32>
    %87 = tpu.matmul %82, %84, %cst_22 {dimension_numbers = #tpu.dot_dimension_numbers<[1], [1], [0], [0], [0, 0, 1, 0], [], []>} : vector<16x8xbf16>, vector<16x8xbf16>, vector<16x16xf32> -> vector<16x16xf32>
    %88 = arith.addf %87, %17 : vector<16x16xf32>
    %cst_23 = arith.constant dense<0xFF800000> : vector<16xf32>
    %89 = vector.multi_reduction <maximumf>, %88, %cst_23 [1] : vector<16x16xf32> to vector<16xf32>
    %90 = vector.shape_cast %89 : vector<16xf32> to vector<16x1xf32>
    %91 = vector.broadcast %90 : vector<16x1xf32> to vector<16x16xf32>
    %92 = arith.subf %88, %91 : vector<16x16xf32>
    %93 = math.exp %92 : vector<16x16xf32>
    %cst_24 = arith.constant dense<0.000000e+00> : vector<16xf32>
    %94 = vector.multi_reduction <add>, %93, %cst_24 [1] : vector<16x16xf32> to vector<16xf32>
    %95 = vector.shape_cast %94 : vector<16xf32> to vector<16x1xf32>
    %96 = tpu.reciprocal %95 {approx = true} : vector<16x1xf32> -> vector<16x1xf32>
    %97 = vector.broadcast %96 : vector<16x1xf32> to vector<16x16xf32>
    %98 = arith.mulf %93, %97 : vector<16x16xf32>
    %99 = arith.truncf %98 : vector<16x16xf32> to vector<16x16xbf16>
    %cst_25 = arith.constant dense<0.000000e+00> : vector<16x8xf32>
    %100 = tpu.matmul %99, %86, %cst_25 {dimension_numbers = #tpu.dot_dimension_numbers<[1], [0], [0], [1], [0, 0, 1, 1], [], []>} : vector<16x16xbf16>, vector<16x8xbf16>, vector<16x8xf32> -> vector<16x8xf32>
    %c0_26 = arith.constant 0 : index
    %c24 = arith.constant 24 : index
    %101 = vector.load %arg3[%c0_26, %c24] : memref<16x32xf32, #tpu.memory_space<vmem>>, vector<16x8xf32>
    tpu.vector_store %arg3[%c0_26, %c24], %100 {strides = array<i32>} : memref<16x32xf32, #tpu.memory_space<vmem>>, vector<16x8xf32>,
    %c0_27 = arith.constant 0 : index
    %c0_28 = arith.constant 0 : index
    %102 = vector.load %arg3[%c0_27, %c0_28] : memref<16x32xf32, #tpu.memory_space<vmem>>, vector<16x32xf32>
    %103 = arith.truncf %102 : vector<16x32xf32> to vector<16x32xbf16>
    %cst_29 = arith.constant dense<0.000000e+00> : vector<16x32xf32>
    %104 = tpu.matmul %103, %5, %cst_29 {dimension_numbers = #tpu.dot_dimension_numbers<[1], [0], [0], [1], [0, 0, 1, 1], [], []>} : vector<16x32xbf16>, vector<32x32xbf16>, vector<16x32xf32> -> vector<16x32xf32>
    %c0_30 = arith.constant 0 : index
    %c0_31 = arith.constant 0 : index
    %105 = vector.load %arg2[%c0_30, %c0_31] : memref<16x32xf32, #tpu.memory_space<vmem>>, vector<16x32xf32>
    tpu.vector_store %arg2[%c0_30, %c0_31], %104 {strides = array<i32>} : memref<16x32xf32, #tpu.memory_space<vmem>>, vector<16x32xf32>,
    return
  }
}

</mosaic_0001>

<bundles_post_ra>
// kernel: decoder_attn.1
= control target key start
LH: loop header
LB: loop body
LE: loop exit
PB: predicated region body
PF: predicated region fallthrough
CT: control target
= control target key end

     0   :  { %7 = vsyncpa [#allocation4], 0  ;;  %s1090_s0 = inlined_call_operand.hbm [shape: f32[16,32], index: 0, kind: input, shape index: {}]   ;;  %s1091_s1 = inlined_call_operand.hbm [shape: bf16[32,128], index: 1, kind: input, shape index: {}]   ;;  %s1092_s2 = inlined_call_operand.hbm [shape: f32[16,32], index: 2, kind: output, shape index: {}]  }
   0x1   :  { %8 = vsyncpa [#allocation7], 0 }
   0x2   :  { %9 = vsyncpa [#allocation5], 0  ;;  %s936_s9 = smov [#allocation3]  }
   0x3   :  { %s15_s10 = sshll.u32 %s936_s9, 4  ;;  %s16_s10 = int_to_ptr.vmem [resolvable:$true] %s15_s10 }
   0x4   :  { %s878_s11 = scalar_lea.vmem %s16_s10, 256  ;;  %p883_p1 = scmp.lt.s32.totalorder %s16_s10, %s16_s10 }
   0x5   :  { %p879_p0 = scmp.ne.s32.totalorder %s16_s10, %s878_s11  ;;  %p884_p2 = scmp.lt.s32.totalorder %s878_s11, %s878_s11 }
   0x7   :  { %p885_p3 = por %p884_p2, %p883_p1 }
   0x9   :  { %p886_p4 = pnand %p885_p3, %p879_p0 }
   0xb   :  { %889 = shalt.err (!%p886_p4)
}
   0xc   :  { %s937_s12 = smov 128   ;;  %s938_s13 = smov 8  }
   0xd   :  { %21 = dma.hbm_to_vmem [thread:$0]  %s1090_s0, 256, %s16_s10, [#allocation4], %s937_s12, %s937_s12, %s938_s13  }
   0xe   :  { %s939_s16 = smov [#allocation6]  }
   0xf   :  { %s27_s17 = sshll.u32 %s939_s16, 4  ;;  %s28_s17 = int_to_ptr.vmem [resolvable:$true] %s27_s17 }
  0x10   :  { %s898_s18 = scalar_lea.vmem %s28_s17, 256  ;;  %p903_p6 = scmp.lt.s32.totalorder %s28_s17, %s28_s17 }
  0x11   :  { %p899_p5 = scmp.ne.s32.totalorder %s28_s17, %s898_s18  ;;  %p904_p7 = scmp.lt.s32.totalorder %s898_s18, %s898_s18 }
  0x13   :  { %p905_p8 = por %p904_p7, %p903_p6 }
  0x15   :  { %p906_p9 = pnand %p905_p8, %p899_p5 }
  0x17   :  { %909 = shalt.err (!%p906_p9)
}
  0x18   :  { %s940_s19 = smov 64   ;;  %s941_s20 = smov 4  }
  0x19   :  { %33 = dma.hbm_to_vmem [thread:$0]  %s1091_s1, 256, %s28_s17, [#allocation7], %s940_s19, %s940_s19, %s941_s20  }
  0x1a   :  { %930 = dma.done.wait [#allocation4], 256  }
  0x1b   :  { %931 = vsyncadd [#allocation4], 4294967040 }
  0x1c   :  { %932 = dma.done.wait [#allocation7], 256  }
  0x1d   :  { %933 = vsyncadd [#allocation7], 4294967040  ;;  %v942_v0 = vmov 0.0   ;;  %vm943_vm0 = vmmov 0   ;;  %v991_v1 = vld [vmem:[#allocation6 + $0x8] sm:$0xff]   ;;  %v994_v2 = vld [vmem:[#allocation6] sm:$0xff]   ;;  %v105_v22 = vlaneseq }
  0x1e   :  { %749 = vmatprep.subr.bf16.mxu0 %v942_v0  ;;  %753 = vmatprep.mubr.msk.bf16.mxu0 %vm943_vm0, %v942_v0  ;;  %v41_v3 = vld [vmem:[#allocation3] sm:$0xff]  ;;  %v42_v4 = vld [vmem:[#allocation3 + $0x8] sm:$0xff]  ;;  %vm60_vm1 = vcmask 261120   ;;  %s944_s0 = smov 120   ;;  %s945_s1 = smov 96   ;;  %vm125_vm2 = vcmask 64512  }
  0x1f   :  { %757 = vmatprep.subr.bf16.mxu1 %v942_v0  ;;  %759 = vmatprep.mubr.msk.bf16.mxu1 %vm943_vm0, %v942_v0  ;;  %v43_v5 = vpack.c.bf16 %v42_v4, %v41_v3  ;;  %s946_s23 = smov 80   ;;  %s947_s24 = smov 88   ;;  %v106_v23 = vshrl.u32 %v105_v22, 7  ;;  %v109_v24 = vand.u32 127, %v105_v22  ;;  %v951_v29 = vmov -1e+30  }
  0x20   :  { %750 = vmatpush3.bf16.msra.mxu0 %v991_v1  ;;  %s948_s25 = smov 72   ;;  %s949_s26 = smov 112   ;;  %vm173_vm9 = vcmask 130048   ;;  %vm375_vm10 = vcmask 130112   ;;  %vm507_vm11 = vcmask 195712   ;;  %vm639_vm12 = vcmask 261312  }
  0x21   :  { %751 = vmatprep.subr.bf16.mxu0 %v942_v0  ;;  %s950_s27 = smov 104   ;;  %v110_v25 = vshrl.u32 %v106_v23, 3  ;;  %v112_v26 = vshrl.u32 %v109_v24, 3  ;;  %v107_v27 = vadd.s32 8, %v106_v23  ;;  %vm115_vm4 = vcmp.le.s32.totalorder %v109_v24, %v106_v23  ;;  %s952_s28 = smov 56  }
  0x22   :  { %s953_s29 = smov 48   ;;  %s954_s30 = smov 40  }
  0x23   :  { %vm113_vm3 = vcmp.eq.s32.totalorder %v110_v25, %v112_v26  ;;  %v111_v28 = vshrl.u32 %v107_v27, 3  ;;  %vm116_vm7 = vcmp.le.s32.totalorder %v109_v24, %v107_v27  ;;  %s955_s3 = smov 16   ;;  %s956_s4 = smov 24  }
  0x24   :  { %752 = vmatpush3.bf16.msra.mxu0 %v994_v2  ;;  %vm117_vm5 = vmand %vm113_vm3, %vm115_vm4  ;;  %s957_s5 = smov 32   ;;  %s958_s6 = smov [#allocation8]  }
  0x25   :  { %763 = vmatprep.subr.bf16.mxu0 %v942_v0  ;;  %vm114_vm6 = vcmp.eq.s32.totalorder %v111_v28, %v112_v26  ;;  %v119_v30 = vsel %vm117_vm5, 0.0, %v951_v29  ;;  %s702_s7 = sshll.u32 %s958_s6, 4  ;;  %s703_s7 = int_to_ptr.vmem [resolvable:$true] %s702_s7 }
  0x26   :  { %vm118_vm8 = vmand %vm114_vm6, %vm116_vm7  ;;  %s910_s8 = scalar_lea.vmem %s703_s7, 256  ;;  %p915_p11 = scmp.lt.s32.totalorder %s703_s7, %s703_s7 }
  0x27   :  { %754 = vmatmul.mubr.msk.bf16.vlgmr.msra.gmra.mxu0 %vm60_vm1, %v43_v5  ;;  %v120_v34 = vsel %vm118_vm8, 0.0, %v951_v29  ;;  %p911_p10 = scmp.ne.s32.totalorder %s703_s7, %s910_s8  ;;  %p916_p12 = scmp.lt.s32.totalorder %s910_s8, %s910_s8 }
  0x28   :  { %765 = vmatprep.mubr.msk.bf16.mxu0 %vm943_vm0, %v942_v0 }
  0x29   :  { %p917_p13 = por %p916_p12, %p915_p11 }
  0x2b   :  { %p918_p0 = pnand %p917_p13, %p911_p10 }
  0xe7   :  { %v98_v6 = vpop.f32.mrf.mxu0 }
  0xe9   :  { %v755_v7 = vpop.f32.mrf.mxu0 }
  0xeb   :  { %v101_v8 = vpop.f32.mrf.mxu0 }
  0xec   :  { %v1002_v9 = vpack.c.bf16 %v101_v8, %v98_v6 }
  0xed   :  { %v756_v10 = vpop.f32.mrf.mxu0 }
  0xee   :  { %246 = vrot.lane.b32.xlu1 %v1002_v9, %s944_s0  ;;  %123 = vrot.lane.b32.xlu0 %v1002_v9, %s945_s1 }
  0xf2   :  { %380 = vrot.lane.b32.xlu1 %v1002_v9, %s946_s23  ;;  %248 = vrot.lane.b32.xlu0 %v1002_v9, %s947_s24 }
  0xf6   :  { %512 = vrot.lane.b32.xlu1 %v1002_v9, %s948_s25  ;;  %378 = vrot.lane.b32.xlu0 %v1002_v9, %s949_s26 }
  0xfa   :  { %510 = vrot.lane.b32.xlu0 %v1002_v9, %s950_s27 }
 0x160   :  { %v124_v11 = vpop.permute.xlu0 %123  ;;  %v247_v14 = vpop.permute.xlu1 %246 }
 0x161   :  { %v130_v12 = vsel %vm125_vm2, %v124_v11, 0 }
 0x162   :  { %758 = vmatpush3.bf16.xpose.msra.mxu1 %v130_v12 }
 0x163   :  { %769 = vmatprep.subr.bf16.mxu1 %v942_v0 }
 0x164   :  { %v249_v13 = vpop.permute.xlu0 %248  ;;  %v381_v16 = vpop.permute.xlu1 %380 }
 0x165   :  { %v254_v15 = vsel %vm125_vm2, %v249_v13, 0  ;;  %v386_v17 = vsel %vm125_vm2, %v381_v16, 0 }
 0x168   :  { %v513_v18 = vpop.permute.xlu1 %512  ;;  %v379_v19 = vpop.permute.xlu0 %378 }
 0x169   :  { %760 = vmatmul.mubr.msk.bf16.vlgmr.msra.gmra.mxu1 %vm125_vm2, %v1002_v9  ;;  %v518_v20 = vsel %vm125_vm2, %v513_v18, 0 }
 0x16a   :  { %770 = vmatpush3.bf16.xpose.msra.mxu1 %v254_v15  ;;  %771 = vmatprep.mubr.msk.bf16.mxu1 %vm943_vm0, %v942_v0 }
 0x16b   :  { %781 = vmatprep.subr.bf16.mxu1 %v942_v0 }
 0x16c   :  { %v511_v21 = vpop.permute.xlu0 %510 }
 0x171   :  { %772 = vmatmul.mubr.msk.bf16.vlgmr.msra.gmra.mxu1 %vm125_vm2, %v247_v14 }
 0x172   :  { %782 = vmatpush3.bf16.xpose.msra.mxu1 %v386_v17  ;;  %783 = vmatprep.mubr.msk.bf16.mxu1 %vm943_vm0, %v942_v0 }
 0x173   :  { %793 = vmatprep.subr.bf16.mxu1 %v942_v0 }
 0x179   :  { %784 = vmatmul.mubr.msk.bf16.vlgmr.msra.gmra.mxu1 %vm125_vm2, %v379_v19 }
 0x17a   :  { %794 = vmatpush3.bf16.xpose.msra.mxu1 %v518_v20  ;;  %795 = vmatprep.mubr.msk.bf16.mxu1 %vm943_vm0, %v942_v0 }
 0x17b   :  { %805 = vmatprep.subr.bf16.mxu1 %v942_v0 }
 0x181   :  { %796 = vmatmul.mubr.msk.bf16.vlgmr.msra.gmra.mxu1 %vm125_vm2, %v511_v21 }
 0x182   :  { %809 = vmatprep.mubr.msk.bf16.mxu1 %vm943_vm0, %v942_v0 }
 0x229   :  { %v166_v31 = vpop.f32.mrf.mxu1 }
 0x22a   :  { %v167_v32 = vadd.f32 %v166_v31, %v119_v30 }
 0x22b   :  { %v761_v33 = vpop.f32.mrf.mxu1 }
 0x22c   :  { %v174_v35 = vsel %vm173_vm9, %v167_v32, -inf }
 0x22d   :  { %175 = vmax.xlane.f32.xlu1 %v174_v35  ;;  %v169_v36 = vpop.f32.mrf.mxu1 }
 0x22e   :  { %v170_v37 = vadd.f32 %v169_v36, %v120_v34 }
 0x22f   :  { %v762_v38 = vpop.f32.mrf.mxu1 }
 0x230   :  { %v177_v39 = vsel %vm173_vm9, %v170_v37, -inf }
 0x231   :  { %178 = vmax.xlane.f32.xlu0 %v177_v39  ;;  %v290_v40 = vpop.f32.mrf.mxu1 }
 0x232   :  { %v291_v41 = vadd.f32 %v290_v40, %v119_v30 }
 0x233   :  { %v773_v42 = vpop.f32.mrf.mxu1 }
 0x234   :  { %v297_v43 = vsel %vm173_vm9, %v291_v41, -inf }
 0x235   :  { %298 = vmax.xlane.f32.xlu0 %v297_v43  ;;  %v293_v44 = vpop.f32.mrf.mxu1 }
 0x236   :  { %v294_v45 = vadd.f32 %v293_v44, %v120_v34 }
 0x237   :  { %v774_v46 = vpop.f32.mrf.mxu1 }
 0x238   :  { %v300_v47 = vsel %vm173_vm9, %v294_v45, -inf }
 0x239   :  { %301 = vmax.xlane.f32.xlu1 %v300_v47  ;;  %v422_v48 = vpop.f32.mrf.mxu1 }
 0x23a   :  { %v423_v49 = vadd.f32 %v422_v48, %v119_v30 }
 0x23b   :  { %v785_v50 = vpop.f32.mrf.mxu1 }
 0x23c   :  { %v429_v51 = vsel %vm173_vm9, %v423_v49, -inf }
 0x23d   :  { %430 = vmax.xlane.f32.xlu0 %v429_v51  ;;  %v425_v52 = vpop.f32.mrf.mxu1 }
 0x23e   :  { %v426_v53 = vadd.f32 %v425_v52, %v120_v34 }
 0x23f   :  { %v786_v54 = vpop.f32.mrf.mxu1 }
 0x240   :  { %v432_v55 = vsel %vm173_vm9, %v426_v53, -inf }
 0x241   :  { %433 = vmax.xlane.f32.xlu1 %v432_v55  ;;  %v554_v56 = vpop.f32.mrf.mxu1 }
 0x242   :  { %v555_v57 = vadd.f32 %v554_v56, %v119_v30 }
 0x243   :  { %v797_v58 = vpop.f32.mrf.mxu1 }
 0x244   :  { %v561_v59 = vsel %vm173_vm9, %v555_v57, -inf }
 0x245   :  { %562 = vmax.xlane.f32.xlu0 %v561_v59  ;;  %v557_v60 = vpop.f32.mrf.mxu1 }
 0x246   :  { %v558_v61 = vadd.f32 %v557_v60, %v120_v34 }
 0x247   :  { %v798_v62 = vpop.f32.mrf.mxu1 }
 0x248   :  { %v564_v63 = vsel %vm173_vm9, %v558_v61, -inf }
 0x249   :  { %565 = vmax.xlane.f32.xlu1 %v564_v63 }
 0x2b6   :  { %v176_v3 = vpop.xlane.xlu1 %175 }
 0x2b7   :  { %v180_v4 = vsub.f32 %v167_v32, %v176_v3 }
 0x2b9   :  { %v182_v5 = vmul.f32 1.442695, %v180_v4 }
 0x2ba   :  { %v179_v6 = vpop.xlane.xlu0 %178 }
 0x2bb   :  { %838 = vpow2.f32 %v182_v5  ;;  %v181_v7 = vsub.f32 %v170_v37, %v179_v6 }
 0x2bd   :  { %v184_v8 = vmul.f32 1.442695, %v181_v7 }
 0x2be   :  { %v299_v10 = vpop.xlane.xlu0 %298 }
 0x2bf   :  { %840 = vpow2.f32 %v184_v8  ;;  %v303_v11 = vsub.f32 %v291_v41, %v299_v10 }
 0x2c1   :  { %v305_v12 = vmul.f32 1.442695, %v303_v11 }
 0x2c2   :  { %v302_v19 = vpop.xlane.xlu1 %301 }
 0x2c3   :  { %842 = vpow2.f32 %v305_v12  ;;  %v304_v20 = vsub.f32 %v294_v45, %v302_v19 }
 0x2c5   :  { %v307_v24 = vmul.f32 1.442695, %v304_v20 }
 0x2c6   :  { %v431_v21 = vpop.xlane.xlu0 %430 }
 0x2c7   :  { %v435_v23 = vsub.f32 %v423_v49, %v431_v21  ;;  %844 = vpow2.f32 %v307_v24 }
 0x2c8   :  { %v839_v13 = vpop.eup %838 }
 0x2c9   :  { %v186_v14 = vsel %vm173_vm9, %v839_v13, 0.0  ;;  %v437_v28 = vmul.f32 1.442695, %v435_v23 }
 0x2ca   :  { %187 = vadd.xlane.f32.xlu0 %v186_v14  ;;  %v434_v22 = vpop.xlane.xlu1 %433 }
 0x2cb   :  { %v436_v25 = vsub.f32 %v426_v53, %v434_v22  ;;  %846 = vpow2.f32 %v437_v28 }
 0x2cc   :  { %v841_v15 = vpop.eup %840 }
 0x2cd   :  { %v189_v16 = vsel %vm173_vm9, %v841_v15, 0.0  ;;  %v439_v30 = vmul.f32 1.442695, %v436_v25 }
 0x2ce   :  { %190 = vadd.xlane.f32.xlu1 %v189_v16  ;;  %v563_v26 = vpop.xlane.xlu0 %562 }
 0x2cf   :  { %v567_v29 = vsub.f32 %v555_v57, %v563_v26  ;;  %848 = vpow2.f32 %v439_v30 }
 0x2d0   :  { %v1042_v17 = vpop.eup %842 }
 0x2d1   :  { %v309_v18 = vsel %vm173_vm9, %v1042_v17, 0.0  ;;  %v569_v32 = vmul.f32 1.442695, %v567_v29 }
 0x2d2   :  { %310 = vadd.xlane.f32.xlu0 %v309_v18  ;;  %v566_v27 = vpop.xlane.xlu1 %565 }
 0x2d3   :  { %v568_v31 = vsub.f32 %v558_v61, %v566_v27  ;;  %850 = vpow2.f32 %v569_v32 }
 0x2d4   :  { %v845_v34 = vpop.eup %844 }
 0x2d5   :  { %v571_v33 = vmul.f32 1.442695, %v568_v31  ;;  %v312_v36 = vsel %vm173_vm9, %v845_v34, 0.0 }
 0x2d7   :  { %852 = vpow2.f32 %v571_v33 }
 0x2d8   :  { %v847_v35 = vpop.eup %846 }
 0x2d9   :  { %v441_v40 = vsel %vm173_vm9, %v847_v35, 0.0 }
 0x2dc   :  { %v849_v37 = vpop.eup %848 }
 0x2dd   :  { %v444_v39 = vsel %vm173_vm9, %v849_v37, 0.0 }
 0x2df   :  { %320 = vrot.lane.b32.xlu1 %v1002_v9, %s952_s28 }
 0x2e0   :  { %v1050_v38 = vpop.eup %850 }
 0x2e1   :  { %v573_v43 = vsel %vm173_vm9, %v1050_v38, 0.0 }
 0x2e4   :  { %v853_v41 = vpop.eup %852 }
 0x2e5   :  { %v576_v42 = vsel %vm173_vm9, %v853_v41, 0.0 }
 0x2e8   :  { %197 = vrot.lane.b32.xlu0 %v1002_v9, %s940_s19 }
 0x303   :  { %313 = vadd.xlane.f32.xlu1 %v312_v36 }
 0x307   :  { %445 = vadd.xlane.f32.xlu1 %v444_v39  ;;  %442 = vadd.xlane.f32.xlu0 %v441_v40 }
 0x30b   :  { %577 = vadd.xlane.f32.xlu1 %v576_v42  ;;  %574 = vadd.xlane.f32.xlu0 %v573_v43 }
 0x31c   :  { %452 = vrot.lane.b32.xlu1 %v1002_v9, %s953_s29 }
 0x321   :  { %584 = vrot.lane.b32.xlu0 %v1002_v9, %s954_s30 }
 0x353   :  { %v188_v44 = vpop.xlane.xlu0 %187 }
 0x354   :  { %854 = vrcp.f32 %v188_v44 }
 0x357   :  { %v191_v45 = vpop.xlane.xlu1 %190 }
 0x358   :  { %856 = vrcp.f32 %v191_v45 }
 0x35b   :  { %v311_v46 = vpop.xlane.xlu0 %310  ;;  %v321_v53 = vpop.permute.xlu1 %320 }
 0x35c   :  { %858 = vrcp.f32 %v311_v46 }
 0x35f   :  { %v198_v47 = vpop.permute.xlu0 %197 }
 0x360   :  { %764 = vmatpush3.bf16.msra.mxu0 %v198_v47 }
 0x361   :  { %775 = vmatprep.subr.bf16.mxu0 %v942_v0  ;;  %v855_v48 = vpop.eup %854 }
 0x362   :  { %v194_v50 = vmul.f32 %v855_v48, %v839_v13 }
 0x365   :  { %v857_v49 = vpop.eup %856 }
 0x366   :  { %v195_v51 = vmul.f32 %v857_v49, %v841_v15 }
 0x368   :  { %v196_v52 = vpack.c.bf16 %v195_v51, %v194_v50 }
 0x369   :  { %v859_v58 = vpop.eup %858 }
 0x36a   :  { %766 = vmatmul.mubr.msk.bf16.vlgmr.msra.gmra.mxu0 %vm173_vm9, %v196_v52  ;;  %v317_v60 = vmul.f32 %v859_v58, %v1042_v17 }
 0x36b   :  { %776 = vmatpush3.bf16.msra.mxu0 %v321_v53  ;;  %777 = vmatprep.mubr.msk.bf16.mxu0 %vm943_vm0, %v942_v0 }
 0x36c   :  { %787 = vmatprep.subr.bf16.mxu0 %v942_v0 }
 0x38c   :  { %v314_v9 = vpop.xlane.xlu1 %313 }
 0x38d   :  { %860 = vrcp.f32 %v314_v9 }
 0x390   :  { %v446_v54 = vpop.xlane.xlu1 %445  ;;  %v443_v55 = vpop.xlane.xlu0 %442 }
 0x391   :  { %862 = vrcp.f32 %v446_v54 }
 0x392   :  { %864 = vrcp.f32 %v443_v55 }
 0x394   :  { %v578_v56 = vpop.xlane.xlu1 %577  ;;  %v575_v57 = vpop.xlane.xlu0 %574 }
 0x395   :  { %866 = vrcp.f32 %v578_v56 }
 0x396   :  { %868 = vrcp.f32 %v575_v57 }
 0x398   :  { %v453_v4 = vpop.permute.xlu1 %452  ;;  %v585_v11 = vpop.permute.xlu0 %584 }
 0x39a   :  { %v861_v59 = vpop.eup %860 }
 0x39b   :  { %v318_v61 = vmul.f32 %v861_v59, %v845_v34 }
 0x39d   :  { %v319_v62 = vpack.c.bf16 %v318_v61, %v317_v60 }
 0x39e   :  { %v863_v63 = vpop.eup %862 }
 0x39f   :  { %v865_v3 = vpop.eup %864  ;;  %778 = vmatmul.mubr.msk.bf16.vlgmr.msra.gmra.mxu0 %vm173_vm9, %v319_v62  ;;  %v450_v6 = vmul.f32 %v863_v63, %v849_v37 }
 0x3a0   :  { %788 = vmatpush3.bf16.msra.mxu0 %v453_v4  ;;  %789 = vmatprep.mubr.msk.bf16.mxu0 %vm943_vm0, %v942_v0  ;;  %v449_v5 = vmul.f32 %v865_v3, %v847_v35 }
 0x3a1   :  { %799 = vmatprep.subr.bf16.mxu0 %v942_v0 }
 0x3a2   :  { %v867_v7 = vpop.eup %866  ;;  %v451_v8 = vpack.c.bf16 %v450_v6, %v449_v5 }
 0x3a3   :  { %v869_v10 = vpop.eup %868  ;;  %v582_v13 = vmul.f32 %v867_v7, %v853_v41 }
 0x3a4   :  { %v581_v12 = vmul.f32 %v869_v10, %v1050_v38 }
 0x3a6   :  { %v583_v14 = vpack.c.bf16 %v582_v13, %v581_v12 }
 0x3a7   :  { %790 = vmatmul.mubr.msk.bf16.vlgmr.msra.gmra.mxu0 %vm173_vm9, %v451_v8 }
 0x3a8   :  { %800 = vmatpush3.bf16.msra.mxu0 %v585_v11  ;;  %801 = vmatprep.mubr.msk.bf16.mxu0 %vm943_vm0, %v942_v0 }
 0x3af   :  { %802 = vmatmul.mubr.msk.bf16.vlgmr.msra.gmra.mxu0 %vm173_vm9, %v583_v14 }
 0x42a   :  { %v237_v15 = vpop.f32.mrf.mxu0 }
 0x42b   :  { %244 = vst.msk [vmem:[#allocation2] sm:$0xff] %vm125_vm2, %v237_v15 }
 0x42c   :  { %v767_v16 = vpop.f32.mrf.mxu0 }
 0x42e   :  { %v240_v17 = vpop.f32.mrf.mxu0 }
 0x42f   :  { %245 = vst.msk [vmem:[#allocation2 + $0x8] sm:$0xff] %vm125_vm2, %v240_v17 }
 0x430   :  { %v768_v18 = vpop.f32.mrf.mxu0 }
 0x45f   :  { %v360_v19 = vpop.f32.mrf.mxu0 }
 0x460   :  { %369 = vrot.lane.b32.xlu1 %v360_v19, %s938_s13 }
 0x461   :  { %v779_v20 = vpop.f32.mrf.mxu0 }
 0x463   :  { %v363_v21 = vpop.f32.mrf.mxu0 }
 0x464   :  { %371 = vrot.lane.b32.xlu0 %v363_v21, %s938_s13 }
 0x465   :  { %v780_v22 = vpop.f32.mrf.mxu0 }
 0x467   :  { %v492_v23 = vpop.f32.mrf.mxu0 }
 0x468   :  { %501 = vrot.lane.b32.xlu1 %v492_v23, %s955_s3 }
 0x469   :  { %v791_v24 = vpop.f32.mrf.mxu0 }
 0x46b   :  { %v495_v25 = vpop.f32.mrf.mxu0 }
 0x46c   :  { %503 = vrot.lane.b32.xlu0 %v495_v25, %s955_s3 }
 0x46d   :  { %v792_v26 = vpop.f32.mrf.mxu0 }
 0x46f   :  { %v624_v27 = vpop.f32.mrf.mxu0 }
 0x470   :  { %633 = vrot.lane.b32.xlu1 %v624_v27, %s956_s4 }
 0x471   :  { %v803_v28 = vpop.f32.mrf.mxu0 }
 0x473   :  { %v627_v29 = vpop.f32.mrf.mxu0 }
 0x474   :  { %635 = vrot.lane.b32.xlu0 %v627_v29, %s956_s4  ;;  %647 = vrot.lane.b32.xlu1 %v991_v1, %s957_s5 }
 0x475   :  { %v804_v30 = vpop.f32.mrf.mxu0 }
 0x478   :  { %645 = vrot.lane.b32.xlu0 %v994_v2, %s957_s5 }
 0x4d2   :  { %v370_v31 = vpop.permute.xlu1 %369 }
 0x4d3   :  { %376 = vst.msk [vmem:[#allocation2] sm:$0xff] %vm375_vm10, %v370_v31 }
 0x4d6   :  { %v372_v32 = vpop.permute.xlu0 %371 }
 0x4d7   :  { %377 = vst.msk [vmem:[#allocation2 + $0x8] sm:$0xff] %vm375_vm10, %v372_v32 }
 0x4da   :  { %v502_v33 = vpop.permute.xlu1 %501 }
 0x4db   :  { %508 = vst.msk [vmem:[#allocation2] sm:$0xff] %vm507_vm11, %v502_v33 }
 0x4de   :  { %v504_v34 = vpop.permute.xlu0 %503 }
 0x4df   :  { %509 = vst.msk [vmem:[#allocation2 + $0x8] sm:$0xff] %vm507_vm11, %v504_v34 }
 0x4e2   :  { %v634_v35 = vpop.permute.xlu1 %633 }
 0x4e3   :  { %640 = vst.msk [vmem:[#allocation2] sm:$0xff] %vm639_vm12, %v634_v35 }
 0x4e6   :  { %v636_v36 = vpop.permute.xlu0 %635  ;;  %v648_v37 = vpop.permute.xlu1 %647 }
 0x4e7   :  { %641 = vst.msk [vmem:[#allocation2 + $0x8] sm:$0xff] %vm639_vm12, %v636_v36  ;;  %806 = vmatpush3.bf16.msra.mxu1 %v648_v37 }
 0x4e8   :  { %807 = vmatprep.subr.bf16.mxu1 %v942_v0 }
 0x4ea   :  { %v646_v1 = vpop.permute.xlu0 %645  ;;  %v642_v2 = vld [vmem:[#allocation2] sm:$0xff] }
 0x4eb   :  { %808 = vmatpush3.bf16.msra.mxu1 %v646_v1 }
 0x4ee   :  { %v643_v38 = vld [vmem:[#allocation2 + $0x8] sm:$0xff] }
 0x4ef   :  { %v644_v39 = vpack.c.bf16 %v643_v38, %v642_v2 }
 0x4f1   :  { %810 = vmatmul.mubr.msk.bf16.vlgmr.msra.gmra.mxu1 %vm60_vm1, %v644_v39 }
 0x5b1   :  { %v688_v40 = vpop.f32.mrf.mxu1 }
 0x5b2   :  { %695 = vst.msk [vmem:[#allocation8] sm:$0xff] %vm60_vm1, %v688_v40 }
 0x5b3   :  { %v811_v41 = vpop.f32.mrf.mxu1 }
 0x5b5   :  { %v691_v42 = vpop.f32.mrf.mxu1 }
 0x5b6   :  { %696 = vst.msk [vmem:[#allocation8 + $0x8] sm:$0xff] %vm60_vm1, %v691_v42 }
 0x5b7   :  { %v812_v43 = vpop.f32.mrf.mxu1 }
 0x5b8   :  { %921 = shalt.err (!%p918_p0)
}
 0x5b9   :  { %708 = dma.vmem_to_hbm [thread:$0]  %s703_s7, 256, %s1092_s2, [#allocation5], %s937_s12, %s937_s12, %s938_s13  }
 0x5ba   :  { %934 = dma.done.wait [#allocation5], 256  }
 0x5bb   :  { %935 = vsyncadd [#allocation5], 4294967040 }
 0x5bc   :  { %712 = vsyncpa [#allocation4], 1 }
 0x5bd   :  { %713 = vsyncpa [#allocation7], 1 }
 0x5be   :  { %714 = vsyncpa [#allocation5], 1 }

</bundles_post_ra>
